<compile_context>
chip_gen: v7x
topology: tpu7x:2x2x1
jax: 0.10.0
libtpu: 0.0.40
codegen_flags: <defaults>
</compile_context>

<pallas_src>
import jax
import jax.numpy as jnp
from jax.experimental import pallas as pl
from jax.experimental.pallas import tpu as pltpu

_LANES = 128
_MIN_PALLAS_BYTES = 2 * 1024 * 1024   # below this, XLA's metadata/fused reshape wins
_SPLIT_BYTES = 4 * 1024 * 1024        # issue several in-flight DMAs above this
_MAX_CHUNKS = 4


def _resolve_shape(new_shape, total):
    """Resolve a single -1 entry like torch.Tensor.view does."""
    new_shape = list(new_shape)
    neg = [i for i, d in enumerate(new_shape) if d == -1]
    if len(neg) > 1:
        raise ValueError("only one dimension can be -1")
    if neg:
        known = 1
        for d in new_shape:
            if d != -1:
                known *= d
        if known == 0 or total % known != 0:
            raise ValueError(f"cannot reshape {total} elements into {new_shape}")
        new_shape[neg[0]] = total // known
    else:
        prod = 1
        for d in new_shape:
            prod *= d
        if prod != total:
            raise ValueError(f"cannot reshape {total} elements into {new_shape}")
    return tuple(new_shape)


def _make_dma_copy_kernel(n_chunks, chunk_rows):
    """HBM->HBM copy: issue all chunk DMAs, then wait. No VMEM, no vector work."""

    def kernel(x_hbm_ref, o_hbm_ref, sems):
        copies = []
        for c in range(n_chunks):                      # static Python loop
            sl = pl.ds(c * chunk_rows, chunk_rows)     # static offset/size
            cp = pltpu.make_async_copy(
                x_hbm_ref.at[sl], o_hbm_ref.at[sl], sems.at[c])
            cp.start()
            copies.append(cp)
        for cp in copies:
            cp.wait()

    return kernel


def _num_chunks(lead_dim, nbytes):
    """How many equal DMA chunks to issue along the leading dim."""
    if nbytes < _SPLIT_BYTES:
        return 1
    for n in (_MAX_CHUNKS, 2):
        if lead_dim >= n and lead_dim % n == 0:
            return n
    return 1


def _use_pallas_copy(x, out_shape, nbytes):
    """Gate: only copy when neither boundary reshape forces a TPU relayout."""
    if x.size == 0 or x.ndim == 0 or len(out_shape) == 0:
        return False
    if nbytes < _MIN_PALLAS_BYTES:
        return False
    return (x.shape[-1] % _LANES == 0) and (out_shape[-1] % _LANES == 0)


def pallas_reshape(x, new_shape):
    """Equivalent of `x.view(*new_shape)`; materializing copy done in Pallas
    only when it is free of extra relayout traffic."""
    total = x.size
    out_shape = _resolve_shape(new_shape, total)
    itemsize = jnp.dtype(x.dtype).itemsize
    nbytes = total * itemsize

    if not _use_pallas_copy(x, out_shape, nbytes):
        # Metadata-only (or cheap XLA) reshape: strictly cheaper than any copy.
        return jnp.reshape(x, out_shape)

    n_chunks = _num_chunks(x.shape[0], nbytes)
    chunk_rows = x.shape[0] // n_chunks

    copied = pl.pallas_call(
        _make_dma_copy_kernel(n_chunks, chunk_rows),
        out_shape=jax.ShapeDtypeStruct(x.shape, x.dtype),
        in_specs=[pl.BlockSpec(memory_space=pl.ANY)],    # raw HBM ref, no auto-DMA
        out_specs=pl.BlockSpec(memory_space=pl.ANY),
        scratch_shapes=[pltpu.SemaphoreType.DMA((n_chunks,))],
        cost_estimate=pl.CostEstimate(
            flops=0, transcendentals=0, bytes_accessed=2 * nbytes),
    )(x)

    # Both trailing dims are lane-aligned -> this reshape is metadata only.
    return jnp.reshape(copied, out_shape)


class Reshape:
    """JAX/Pallas port of the torch Reshape module."""

    def __init__(self, shape):
        self.new_shape = tuple(shape)

    def __call__(self, x):
        return pallas_reshape(x, self.new_shape)

    def __repr__(self):
        return f"Reshape(new_shape={self.new_shape})"


if __name__ == "__main__":
    key = jax.random.PRNGKey(0)

    # 1) Module-sized check (NCHW, small trailing dims): metadata-only fallback,
    #    exactly like torch .view semantics.
    x = jax.random.normal(key, (2, 4, 16, 16), dtype=jnp.float32)
    mod = Reshape((2, -1, 16))
    y = jax.block_until_ready(mod(x))
    assert y.shape == (2, 64, 16), y.shape
    assert y.dtype == x.dtype
    assert bool(jnp.all(y == x.reshape(2, -1, 16)))

    # 2) Pallas HBM->HBM DMA path, chunked (4 MiB f32, lane-aligned both sides).
    x2 = jax.random.normal(jax.random.PRNGKey(1), (2048, 512), dtype=jnp.float32)
    y2 = jax.block_until_ready(Reshape((-1, 256))(x2))
    assert y2.shape == (4096, 256), y2.shape
    assert bool(jnp.all(y2 == x2.reshape(4096, 256)))

    # 3) Pallas DMA path, single transfer, bf16 (2 MiB).
    x3 = jax.random.normal(jax.random.PRNGKey(2), (1024, 1024), dtype=jnp.bfloat16)
    y3 = jax.block_until_ready(Reshape((2048, -1))(x3))
    assert y3.shape == (2048, 512), y3.shape
    assert bool(jnp.all(y3 == x3.reshape(2048, 512)))

    # 4) Ragged element count / tiny tensor: always metadata-only reshape.
    x4 = jax.random.normal(jax.random.PRNGKey(3), (3, 5, 7), dtype=jnp.float32)
    y4 = jax.block_until_ready(Reshape((-1,))(x4))
    assert y4.shape == (105,), y4.shape
    assert bool(jnp.all(y4 == x4.reshape(-1)))

    print("KERNEL_OK")
</pallas_src>

<mosaic_0001>
module attributes {stable_mosaic.version = 11 : i64} {
  func.func @kernel(%arg0: memref<2048x512xf32, #tpu.memory_space<any>>, %arg1: memref<2048x512xf32, #tpu.memory_space<any>>, %arg2: memref<4x!tpu.dma_semaphore, #tpu.memory_space<semaphore_mem>>) attributes {dimension_semantics = [], scalar_prefetch = 0 : i64, scratch_operands = 1 : i64, tpu.core_type = #tpu.core_type<tc>} {
    %c0_i32 = arith.constant 0 : i32
    %c0_i32_0 = arith.constant 0 : i32
    %c0_i32_1 = arith.constant 0 : i32
    %0 = tpu.memref_slice %arg0[%c0_i32_0, %c0_i32_1] : memref<2048x512xf32, #tpu.memory_space<any>> -> memref<512x512xf32, #tpu.memory_space<any>>
    %c0_i32_2 = arith.constant 0 : i32
    %c0_i32_3 = arith.constant 0 : i32
    %1 = tpu.memref_slice %arg1[%c0_i32_2, %c0_i32_3] : memref<2048x512xf32, #tpu.memory_space<any>> -> memref<512x512xf32, #tpu.memory_space<any>>
    %2 = tpu.memref_slice %arg2[%c0_i32] : memref<4x!tpu.dma_semaphore, #tpu.memory_space<semaphore_mem>> -> memref<1x!tpu.dma_semaphore, #tpu.memory_space<semaphore_mem>>
    %3 = tpu.memref_squeeze %2 : memref<1x!tpu.dma_semaphore, #tpu.memory_space<semaphore_mem>> -> memref<!tpu.dma_semaphore, #tpu.memory_space<semaphore_mem>>
    tpu.enqueue_dma source(%0 : memref<512x512xf32, #tpu.memory_space<any>>) target(%1 : memref<512x512xf32, #tpu.memory_space<any>>) target_semaphore(%3 : memref<!tpu.dma_semaphore, #tpu.memory_space<semaphore_mem>>)
    %c1_i32 = arith.constant 1 : i32
    %c512_i32 = arith.constant 512 : i32
    %c0_i32_4 = arith.constant 0 : i32
    %4 = tpu.memref_slice %arg0[%c512_i32, %c0_i32_4] : memref<2048x512xf32, #tpu.memory_space<any>> -> memref<512x512xf32, #tpu.memory_space<any>>
    %c512_i32_5 = arith.constant 512 : i32
    %c0_i32_6 = arith.constant 0 : i32
    %5 = tpu.memref_slice %arg1[%c512_i32_5, %c0_i32_6] : memref<2048x512xf32, #tpu.memory_space<any>> -> memref<512x512xf32, #tpu.memory_space<any>>
    %6 = tpu.memref_slice %arg2[%c1_i32] : memref<4x!tpu.dma_semaphore, #tpu.memory_space<semaphore_mem>> -> memref<1x!tpu.dma_semaphore, #tpu.memory_space<semaphore_mem>>
    %7 = tpu.memref_squeeze %6 : memref<1x!tpu.dma_semaphore, #tpu.memory_space<semaphore_mem>> -> memref<!tpu.dma_semaphore, #tpu.memory_space<semaphore_mem>>
    tpu.enqueue_dma source(%4 : memref<512x512xf32, #tpu.memory_space<any>>) target(%5 : memref<512x512xf32, #tpu.memory_space<any>>) target_semaphore(%7 : memref<!tpu.dma_semaphore, #tpu.memory_space<semaphore_mem>>)
    %c2_i32 = arith.constant 2 : i32
    %c1024_i32 = arith.constant 1024 : i32
    %c0_i32_7 = arith.constant 0 : i32
    %8 = tpu.memref_slice %arg0[%c1024_i32, %c0_i32_7] : memref<2048x512xf32, #tpu.memory_space<any>> -> memref<512x512xf32, #tpu.memory_space<any>>
    %c1024_i32_8 = arith.constant 1024 : i32
    %c0_i32_9 = arith.constant 0 : i32
    %9 = tpu.memref_slice %arg1[%c1024_i32_8, %c0_i32_9] : memref<2048x512xf32, #tpu.memory_space<any>> -> memref<512x512xf32, #tpu.memory_space<any>>
    %10 = tpu.memref_slice %arg2[%c2_i32] : memref<4x!tpu.dma_semaphore, #tpu.memory_space<semaphore_mem>> -> memref<1x!tpu.dma_semaphore, #tpu.memory_space<semaphore_mem>>
    %11 = tpu.memref_squeeze %10 : memref<1x!tpu.dma_semaphore, #tpu.memory_space<semaphore_mem>> -> memref<!tpu.dma_semaphore, #tpu.memory_space<semaphore_mem>>
    tpu.enqueue_dma source(%8 : memref<512x512xf32, #tpu.memory_space<any>>) target(%9 : memref<512x512xf32, #tpu.memory_space<any>>) target_semaphore(%11 : memref<!tpu.dma_semaphore, #tpu.memory_space<semaphore_mem>>)
    %c3_i32 = arith.constant 3 : i32
    %c1536_i32 = arith.constant 1536 : i32
    %c0_i32_10 = arith.constant 0 : i32
    %12 = tpu.memref_slice %arg0[%c1536_i32, %c0_i32_10] : memref<2048x512xf32, #tpu.memory_space<any>> -> memref<512x512xf32, #tpu.memory_space<any>>
    %c1536_i32_11 = arith.constant 1536 : i32
    %c0_i32_12 = arith.constant 0 : i32
    %13 = tpu.memref_slice %arg1[%c1536_i32_11, %c0_i32_12] : memref<2048x512xf32, #tpu.memory_space<any>> -> memref<512x512xf32, #tpu.memory_space<any>>
    %14 = tpu.memref_slice %arg2[%c3_i32] : memref<4x!tpu.dma_semaphore, #tpu.memory_space<semaphore_mem>> -> memref<1x!tpu.dma_semaphore, #tpu.memory_space<semaphore_mem>>
    %15 = tpu.memref_squeeze %14 : memref<1x!tpu.dma_semaphore, #tpu.memory_space<semaphore_mem>> -> memref<!tpu.dma_semaphore, #tpu.memory_space<semaphore_mem>>
    tpu.enqueue_dma source(%12 : memref<512x512xf32, #tpu.memory_space<any>>) target(%13 : memref<512x512xf32, #tpu.memory_space<any>>) target_semaphore(%15 : memref<!tpu.dma_semaphore, #tpu.memory_space<semaphore_mem>>)
    %c0_i32_13 = arith.constant 0 : i32
    %c0_i32_14 = arith.constant 0 : i32
    %c0_i32_15 = arith.constant 0 : i32
    %16 = tpu.memref_slice %arg0[%c0_i32_14, %c0_i32_15] : memref<2048x512xf32, #tpu.memory_space<any>> -> memref<512x512xf32, #tpu.memory_space<any>>
    %c0_i32_16 = arith.constant 0 : i32
    %c0_i32_17 = arith.constant 0 : i32
    %17 = tpu.memref_slice %arg1[%c0_i32_16, %c0_i32_17] : memref<2048x512xf32, #tpu.memory_space<any>> -> memref<512x512xf32, #tpu.memory_space<any>>
    %18 = tpu.memref_slice %arg2[%c0_i32_13] : memref<4x!tpu.dma_semaphore, #tpu.memory_space<semaphore_mem>> -> memref<1x!tpu.dma_semaphore, #tpu.memory_space<semaphore_mem>>
    %19 = tpu.memref_squeeze %18 : memref<1x!tpu.dma_semaphore, #tpu.memory_space<semaphore_mem>> -> memref<!tpu.dma_semaphore, #tpu.memory_space<semaphore_mem>>
    tpu.wait_dma2 semaphore(%19 : memref<!tpu.dma_semaphore, #tpu.memory_space<semaphore_mem>>) src(%16 : memref<512x512xf32, #tpu.memory_space<any>>) dst(%17 : memref<512x512xf32, #tpu.memory_space<any>>)
    %c1_i32_18 = arith.constant 1 : i32
    %c512_i32_19 = arith.constant 512 : i32
    %c0_i32_20 = arith.constant 0 : i32
    %20 = tpu.memref_slice %arg0[%c512_i32_19, %c0_i32_20] : memref<2048x512xf32, #tpu.memory_space<any>> -> memref<512x512xf32, #tpu.memory_space<any>>
    %c512_i32_21 = arith.constant 512 : i32
    %c0_i32_22 = arith.constant 0 : i32
    %21 = tpu.memref_slice %arg1[%c512_i32_21, %c0_i32_22] : memref<2048x512xf32, #tpu.memory_space<any>> -> memref<512x512xf32, #tpu.memory_space<any>>
    %22 = tpu.memref_slice %arg2[%c1_i32_18] : memref<4x!tpu.dma_semaphore, #tpu.memory_space<semaphore_mem>> -> memref<1x!tpu.dma_semaphore, #tpu.memory_space<semaphore_mem>>
    %23 = tpu.memref_squeeze %22 : memref<1x!tpu.dma_semaphore, #tpu.memory_space<semaphore_mem>> -> memref<!tpu.dma_semaphore, #tpu.memory_space<semaphore_mem>>
    tpu.wait_dma2 semaphore(%23 : memref<!tpu.dma_semaphore, #tpu.memory_space<semaphore_mem>>) src(%20 : memref<512x512xf32, #tpu.memory_space<any>>) dst(%21 : memref<512x512xf32, #tpu.memory_space<any>>)
    %c2_i32_23 = arith.constant 2 : i32
    %c1024_i32_24 = arith.constant 1024 : i32
    %c0_i32_25 = arith.constant 0 : i32
    %24 = tpu.memref_slice %arg0[%c1024_i32_24, %c0_i32_25] : memref<2048x512xf32, #tpu.memory_space<any>> -> memref<512x512xf32, #tpu.memory_space<any>>
    %c1024_i32_26 = arith.constant 1024 : i32
    %c0_i32_27 = arith.constant 0 : i32
    %25 = tpu.memref_slice %arg1[%c1024_i32_26, %c0_i32_27] : memref<2048x512xf32, #tpu.memory_space<any>> -> memref<512x512xf32, #tpu.memory_space<any>>
    %26 = tpu.memref_slice %arg2[%c2_i32_23] : memref<4x!tpu.dma_semaphore, #tpu.memory_space<semaphore_mem>> -> memref<1x!tpu.dma_semaphore, #tpu.memory_space<semaphore_mem>>
    %27 = tpu.memref_squeeze %26 : memref<1x!tpu.dma_semaphore, #tpu.memory_space<semaphore_mem>> -> memref<!tpu.dma_semaphore, #tpu.memory_space<semaphore_mem>>
    tpu.wait_dma2 semaphore(%27 : memref<!tpu.dma_semaphore, #tpu.memory_space<semaphore_mem>>) src(%24 : memref<512x512xf32, #tpu.memory_space<any>>) dst(%25 : memref<512x512xf32, #tpu.memory_space<any>>)
    %c3_i32_28 = arith.constant 3 : i32
    %c1536_i32_29 = arith.constant 1536 : i32
    %c0_i32_30 = arith.constant 0 : i32
    %28 = tpu.memref_slice %arg0[%c1536_i32_29, %c0_i32_30] : memref<2048x512xf32, #tpu.memory_space<any>> -> memref<512x512xf32, #tpu.memory_space<any>>
    %c1536_i32_31 = arith.constant 1536 : i32
    %c0_i32_32 = arith.constant 0 : i32
    %29 = tpu.memref_slice %arg1[%c1536_i32_31, %c0_i32_32] : memref<2048x512xf32, #tpu.memory_space<any>> -> memref<512x512xf32, #tpu.memory_space<any>>
    %30 = tpu.memref_slice %arg2[%c3_i32_28] : memref<4x!tpu.dma_semaphore, #tpu.memory_space<semaphore_mem>> -> memref<1x!tpu.dma_semaphore, #tpu.memory_space<semaphore_mem>>
    %31 = tpu.memref_squeeze %30 : memref<1x!tpu.dma_semaphore, #tpu.memory_space<semaphore_mem>> -> memref<!tpu.dma_semaphore, #tpu.memory_space<semaphore_mem>>
    tpu.wait_dma2 semaphore(%31 : memref<!tpu.dma_semaphore, #tpu.memory_space<semaphore_mem>>) src(%28 : memref<512x512xf32, #tpu.memory_space<any>>) dst(%29 : memref<512x512xf32, #tpu.memory_space<any>>)
    return
  }
}

</mosaic_0001>

<bundles_post_ra>
// kernel: tpu_custom_call.1
= control target key start
LH: loop header
LB: loop body
LE: loop exit
PB: predicated region body
PF: predicated region fallthrough
CT: control target
= control target key end

     0   :  { %s125_s9 = smov [#allocation2]   ;;  %s126_s10 = smov [#allocation3]   ;;  %s168_s0 = inlined_call_operand.hbm [shape: f32[2048,512], index: 0, kind: input, shape index: {}]   ;;  %s169_s1 = inlined_call_operand.hbm [shape: f32[2048,512], index: 1, kind: output, shape index: {}]  }
   0x1   :  { %s19_s8 = scalar_lea.hbm %s168_s0, 32768  ;;  %s127_s11 = smov 0  }
   0x2   :  { %18 = dma.general %s168_s0, 32768, %s169_s1, %s125_s9, %s126_s10, [#allocation4], %s127_s11, 0  }
   0x3   :  { %s20_s18 = scalar_lea.hbm %s169_s1, 32768  ;;  %s35_s21 = scalar_lea.hbm %s168_s0, 65536 }
   0x4   :  { %s128_s22 = smov [#allocation2 + $0x1]   ;;  %s129_s23 = smov [#allocation5]  }
   0x5   :  { %34 = dma.general %s19_s8, 32768, %s20_s18, %s128_s22, %s129_s23, [#allocation6], %s127_s11, 0  }
   0x6   :  { %s36_s26 = scalar_lea.hbm %s169_s1, 65536  ;;  %s51_s29 = scalar_lea.hbm %s168_s0, 98304 }
   0x7   :  { %s130_s30 = smov [#allocation2 + $0x2]   ;;  %s131_s2 = smov [#allocation7]  }
   0x8   :  { %50 = dma.general %s35_s21, 32768, %s36_s26, %s130_s30, %s131_s2, [#allocation8], %s127_s11, 0  }
   0x9   :  { %s52_s5 = scalar_lea.hbm %s169_s1, 98304  ;;  %s132_s6 = smov [#allocation2 + $0x3]  }
   0xa   :  { %s133_s7 = smov [#allocation9]  }
   0xb   :  { %66 = dma.general %s51_s29, 32768, %s52_s5, %s132_s6, %s133_s7, [#allocation10], %s127_s11, 0  }
   0xc   :  { %117 = dma.done.wait [#allocation2], 32768 }
   0xd   :  { %118 = vsyncadd [#allocation2], 4294934528 }
   0xe   :  { %119 = dma.done.wait [#allocation2 + $0x1], 32768 }
   0xf   :  { %120 = vsyncadd [#allocation2 + $0x1], 4294934528 }
  0x10   :  { %121 = dma.done.wait [#allocation2 + $0x2], 32768 }
  0x11   :  { %122 = vsyncadd [#allocation2 + $0x2], 4294934528 }
  0x12   :  { %123 = dma.done.wait [#allocation2 + $0x3], 32768 }
  0x13   :  { %124 = vsyncadd [#allocation2 + $0x3], 4294934528 }
  0x14   :  { %77 = vsyncmov [#allocation2] }
  0x17   :  { %s78_s0 = vpop.sfrf %77 }
  0x18   :  { %p104_p0 = scmp.ne.s32.totalorder %s78_s0, 0 }
  0x1a   :  { %82 = shalt.err (%p104_p0)  }
  0x1b   :  { %84 = vsyncmov [#allocation2 + $0x1] }
  0x1e   :  { %s85_s8 = vpop.sfrf %84 }
  0x1f   :  { %p105_p1 = scmp.ne.s32.totalorder %s85_s8, 0 }
  0x21   :  { %89 = shalt.err (%p105_p1)  }
  0x22   :  { %91 = vsyncmov [#allocation2 + $0x2] }
  0x25   :  { %s92_s1 = vpop.sfrf %91 }
  0x26   :  { %p106_p2 = scmp.ne.s32.totalorder %s92_s1, 0 }
  0x28   :  { %96 = shalt.err (%p106_p2)  }
  0x29   :  { %98 = vsyncmov [#allocation2 + $0x3] }
  0x2c   :  { %s99_s9 = vpop.sfrf %98 }
  0x2d   :  { %p107_p3 = scmp.ne.s32.totalorder %s99_s9, 0 }
  0x2f   :  { %103 = shalt.err (%p107_p3)  }

</bundles_post_ra>
